<compile_context>
chip_gen: v7x
topology: tpu7x:2x2x1
jax: 0.10.0
libtpu: 0.0.40
codegen_flags: <defaults>
</compile_context>

<pallas_src>
import jax
import jax.numpy as jnp
from jax.experimental import pallas as pl
from jax.experimental.pallas import tpu as pltpu

# ClippedSoftplus defaults
BETA = 1.0
THRESHOLD = 20.0
MIN_VAL = 1e-4
MAX_VAL = 1000.0

# ~2 MiB per block; with default double-buffering of input + output the VMEM
# footprint is ~8 MiB — comfortable on all of v5e / v6e / v7x.
_TARGET_BLOCK_BYTES = 2 * 1024 * 1024


def _clipped_softplus_kernel(x_ref, o_ref):
    # Compute in f32 regardless of storage dtype (exp/log1p precision and
    # correct behaviour for bf16/fp16 inputs); cast back on store.
    x = x_ref[...].astype(jnp.float32)
    bx = BETA * x
    # log1p(exp(.)) is only *used* where bx <= THRESHOLD; clamp the exp
    # argument so the discarded branch never produces inf.
    sp = jnp.log1p(jnp.exp(jnp.minimum(bx, THRESHOLD))) * (1.0 / BETA)
    y = jnp.where(bx > THRESHOLD, x, sp)
    o_ref[...] = jnp.clip(y, MIN_VAL, MAX_VAL).astype(o_ref.dtype)


def _softplus_clip_ref(x):
    """Pure-JAX reference with identical semantics (used for ragged tails and tests)."""
    xf = x.astype(jnp.float32)
    bx = BETA * xf
    sp = jnp.log1p(jnp.exp(jnp.minimum(bx, THRESHOLD))) * (1.0 / BETA)
    y = jnp.where(bx > THRESHOLD, xf, sp)
    return jnp.clip(y, MIN_VAL, MAX_VAL).astype(x.dtype)


def _run_2d(x2d):
    """Run the kernel over a contiguous 2D view (rows, cols); cols is a
    multiple of 128 (or the whole array is a single full-extent block)."""
    rows, cols = x2d.shape
    bytes_per_row = cols * x2d.dtype.itemsize
    # Block rows: multiple of 8, targeting ~_TARGET_BLOCK_BYTES per block.
    target_rows = max(8, (_TARGET_BLOCK_BYTES // bytes_per_row) // 8 * 8)
    if rows <= target_rows:
        block_rows = rows            # single block == full array dims (any shape ok)
    else:
        block_rows = target_rows     # (8,128)-aligned; edge block auto-masked
    grid = (pl.cdiv(rows, block_rows),)
    return pl.pallas_call(
        _clipped_softplus_kernel,
        out_shape=jax.ShapeDtypeStruct((rows, cols), x2d.dtype),
        grid=grid,
        in_specs=[pl.BlockSpec((block_rows, cols), lambda i: (i, 0))],
        out_specs=pl.BlockSpec((block_rows, cols), lambda i: (i, 0)),
        compiler_params=pltpu.CompilerParams(
            dimension_semantics=("parallel",)),
    )(x2d)


def clipped_softplus(x):
    """clamp(softplus(x), MIN_VAL, MAX_VAL) via a Pallas TPU kernel.

    Copy-free for any input whose total size is a multiple of 128 (contiguous
    reshape is free). Ragged sizes run the 128-aligned bulk through the kernel
    and the tiny (<128 element) tail with plain jnp.
    """
    orig_shape = x.shape
    n = x.size
    if n == 0:
        return x
    x_flat = x.reshape(-1)

    # Pick the widest lane count that divides n (lane-dense, unmasked stores).
    cols = next((c for c in (1024, 512, 256, 128) if n % c == 0), None)
    if cols is not None:
        y = _run_2d(x_flat.reshape(n // cols, cols))
        return y.reshape(orig_shape)

    # Ragged total size: kernel on the 128-aligned bulk, plain jnp on the tail.
    n_bulk = (n // 128) * 128
    if n_bulk == 0:  # fewer than 128 elements — not worth a kernel launch
        return _softplus_clip_ref(x_flat).reshape(orig_shape)
    y_bulk = _run_2d(x_flat[:n_bulk].reshape(n_bulk // 128, 128)).reshape(-1)
    y_tail = _softplus_clip_ref(x_flat[n_bulk:])
    return jnp.concatenate([y_bulk, y_tail]).reshape(orig_shape)


if __name__ == "__main__":
    key = jax.random.PRNGKey(0)
    # Small NCHW-style input consistent with an elementwise activation module.
    x = jax.random.normal(key, (2, 4, 16, 16), dtype=jnp.float32) * 5.0

    y = clipped_softplus(x)
    y = jax.block_until_ready(y)

    # Reference 1: same math written in plain JAX (exact semantics incl. threshold).
    y_ref = _softplus_clip_ref(x)
    # Reference 2: independent formulation via jax.nn.softplus (threshold revert
    # differs by < 2e-9 for beta*x > 20, well inside tolerance).
    y_ref2 = jnp.clip(jax.nn.softplus(BETA * x) / BETA, MIN_VAL, MAX_VAL)

    assert y.shape == x.shape
    assert jnp.allclose(y, y_ref, rtol=1e-6, atol=1e-6), "mismatch vs reference"
    assert jnp.allclose(y, y_ref2, rtol=1e-5, atol=1e-6), "mismatch vs jax.nn.softplus"

    print("KERNEL_OK")
</pallas_src>

<mosaic_0001>
module attributes {stable_mosaic.version = 11 : i64} {
  func.func @_clipped_softplus_kernel(%arg0: i32, %arg1: memref<2x1024xf32, #tpu.memory_space<vmem>>, %arg2: memref<2x1024xf32, #tpu.memory_space<vmem>>) attributes {dimension_semantics = [#tpu.dimension_semantics<parallel>], iteration_bounds = array<i64: 1>, scalar_prefetch = 0 : i64, scratch_operands = 0 : i64, tpu.core_type = #tpu.core_type<tc>, window_params = [{transform_indices = @transform_0, window_bounds = array<i64: 2, 1024>}, {transform_indices = @transform_1, window_bounds = array<i64: 2, 1024>}]} {
    %c0 = arith.constant 0 : index
    %c0_0 = arith.constant 0 : index
    %0 = vector.load %arg1[%c0, %c0_0] : memref<2x1024xf32, #tpu.memory_space<vmem>>, vector<2x1024xf32>
    %cst = arith.constant 1.000000e+00 : f32
    %1 = vector.broadcast %cst : f32 to vector<2x1024xf32>
    %2 = arith.mulf %1, %0 : vector<2x1024xf32>
    %cst_1 = arith.constant 2.000000e+01 : f32
    %3 = vector.broadcast %cst_1 : f32 to vector<2x1024xf32>
    %4 = arith.minimumf %2, %3 : vector<2x1024xf32>
    %5 = math.exp %4 : vector<2x1024xf32>
    %6 = math.log1p %5 : vector<2x1024xf32>
    %cst_2 = arith.constant 1.000000e+00 : f32
    %7 = vector.broadcast %cst_2 : f32 to vector<2x1024xf32>
    %8 = arith.mulf %6, %7 : vector<2x1024xf32>
    %cst_3 = arith.constant 2.000000e+01 : f32
    %9 = vector.broadcast %cst_3 : f32 to vector<2x1024xf32>
    %10 = arith.cmpf ogt, %2, %9 : vector<2x1024xf32>
    %11 = arith.select %10, %0, %8 : vector<2x1024xi1>, vector<2x1024xf32>
    %cst_4 = arith.constant 9.99999974E-5 : f32
    %cst_5 = arith.constant 1.000000e+03 : f32
    %12 = vector.broadcast %cst_4 : f32 to vector<2x1024xf32>
    %13 = arith.maximumf %12, %11 : vector<2x1024xf32>
    %14 = vector.broadcast %cst_5 : f32 to vector<2x1024xf32>
    %15 = arith.minimumf %14, %13 : vector<2x1024xf32>
    %c0_6 = arith.constant 0 : index
    %c0_7 = arith.constant 0 : index
    %16 = vector.load %arg2[%c0_6, %c0_7] : memref<2x1024xf32, #tpu.memory_space<vmem>>, vector<2x1024xf32>
    tpu.vector_store %arg2[%c0_6, %c0_7], %15 {strides = array<i32>} : memref<2x1024xf32, #tpu.memory_space<vmem>>, vector<2x1024xf32>,
    return
  }
  func.func @transform_0(%arg0: i32) -> (i32, i32) {
    %c0_i32 = arith.constant 0 : i32
    %c0_i32_0 = arith.constant 0 : i32
    return %arg0, %c0_i32 : i32, i32
  }
  func.func @transform_1(%arg0: i32) -> (i32, i32) {
    %c0_i32 = arith.constant 0 : i32
    %c0_i32_0 = arith.constant 0 : i32
    return %arg0, %c0_i32 : i32, i32
  }
}

</mosaic_0001>

<bundles_post_ra>
// kernel: tpu_custom_call.1
= control target key start
LH: loop header
LB: loop body
LE: loop exit
PB: predicated region body
PF: predicated region fallthrough
CT: control target
= control target key end

     0   :  { %6 = vsyncpa [#allocation3], 0  ;;  %s166_s0 = inlined_call_operand.hbm [shape: f32[2,1024], index: 0, kind: input, shape index: {}]   ;;  %s167_s1 = inlined_call_operand.hbm [shape: f32[2,1024], index: 1, kind: output, shape index: {}]  }
   0x1   :  { %7 = vsyncpa [#allocation4], 0  ;;  %s130_s6 = smov [#allocation2]   ;;  %s82_s10 = scalar_lea.hbm %s166_s0, 256 }
   0x2   :  { %s14_s7 = sshll.u32 %s130_s6, 4  ;;  %p83_p0 = scmp.ne.s32.totalorder %s166_s0, %s82_s10  ;;  %s15_s7 = int_to_ptr.vmem [resolvable:$true] %s14_s7 }
   0x3   :  { %p86_p1 = scmp.lt.u32.totalorder %s82_s10, %s166_s0 }
   0x5   :  { %p88_p2 = pnand %p86_p1, %p83_p0 }
   0x7   :  { %91 = shalt.err (!%p88_p2)
}
   0x8   :  { %s92_s15 = scalar_lea.vmem %s15_s7, 256  ;;  %p97_p4 = scmp.lt.s32.totalorder %s15_s7, %s15_s7 }
   0x9   :  { %p93_p3 = scmp.ne.s32.totalorder %s15_s7, %s92_s15  ;;  %p98_p5 = scmp.lt.s32.totalorder %s92_s15, %s92_s15 }
   0xb   :  { %p99_p6 = por %p98_p5, %p97_p4 }
   0xd   :  { %p100_p7 = pnand %p99_p6, %p93_p3 }
   0xf   :  { %103 = shalt.err (!%p100_p7)
}
  0x10   :  { %17 = dma.hbm_to_vmem [thread:$0]  %s166_s0, 256, %s15_s7, [#allocation3]  }
  0x11   :  { %126 = dma.done.wait [#allocation3], 256  }
  0x12   :  { %127 = vsyncadd [#allocation3], 4294967040  ;;  %v21_v0 = vld [vmem:[#allocation2] sm:$0xff]  ;;  %v22_v1 = vld [vmem:[#allocation2 + $0x8] sm:$0xff]  ;;  %s131_s0 = smov [#allocation5]  }
  0x13   :  { %v23_v2 = vmin.f32 %v21_v0, 20.0  ;;  %v24_v3 = vmin.f32 %v22_v1, 20.0  ;;  %vm47_vm1 = vcmp.gt.f32.partialorder %v21_v0, 20.0  ;;  %vm48_vm3 = vcmp.gt.f32.partialorder %v22_v1, 20.0  ;;  %s63_s18 = sshll.u32 %s131_s0, 4  ;;  %s64_s18 = int_to_ptr.vmem [resolvable:$true] %s63_s18 }
  0x14   :  { %s104_s19 = scalar_lea.vmem %s64_s18, 256  ;;  %p109_p9 = scmp.lt.s32.totalorder %s64_s18, %s64_s18 }
  0x15   :  { %v25_v4 = vmul.f32 1.442695, %v23_v2  ;;  %v27_v5 = vmul.f32 1.442695, %v24_v3  ;;  %p105_p8 = scmp.ne.s32.totalorder %s64_s18, %s104_s19  ;;  %p110_p10 = scmp.lt.s32.totalorder %s104_s19, %s104_s19 }
  0x17   :  { %74 = vpow2.f32 %v25_v4  ;;  %p111_p11 = por %p110_p10, %p109_p9 }
  0x18   :  { %76 = vpow2.f32 %v27_v5 }
  0x19   :  { %p112_p12 = pnand %p111_p11, %p105_p8 }
  0x21   :  { %v75_v6 = vpop.eup %74 }
  0x22   :  { %v77_v7 = vpop.eup %76  ;;  %v29_v8 = vadd.f32 1.0, %v75_v6  ;;  %v32_v10 = vmul.f32 -0.5, %v75_v6  ;;  %v35_v13 = vand.u32 2147483647, %v75_v6 }
  0x23   :  { %v38_v9 = vadd.f32 1.0, %v77_v7  ;;  %v41_v11 = vmul.f32 -0.5, %v77_v7  ;;  %v44_v15 = vand.u32 2147483647, %v77_v7 }
  0x24   :  { %78 = vlog2.f32 %v29_v8  ;;  %v33_v12 = vadd.f32 1.0, %v32_v10  ;;  %vm36_vm0 = vcmp.lt.f32.partialorder %v35_v13, 0.0004427343 }
  0x25   :  { %80 = vlog2.f32 %v38_v9  ;;  %v42_v14 = vadd.f32 1.0, %v41_v11  ;;  %vm45_vm2 = vcmp.lt.f32.partialorder %v44_v15, 0.0004427343 }
  0x26   :  { %v34_v16 = vmul.f32 %v75_v6, %v33_v12 }
  0x27   :  { %v43_v18 = vmul.f32 %v77_v7, %v42_v14 }
  0x2e   :  { %v79_v17 = vpop.eup %78 }
  0x2f   :  { %v81_v19 = vpop.eup %80  ;;  %v31_v20 = vmul.f32 0.6931472, %v79_v17 }
  0x30   :  { %v40_v21 = vmul.f32 0.6931472, %v81_v19 }
  0x31   :  { %v37_v22 = vsel %vm36_vm0, %v34_v16, %v31_v20 }
  0x32   :  { %v49_v23 = vsel %vm47_vm1, %v21_v0, %v37_v22  ;;  %v46_v24 = vsel %vm45_vm2, %v43_v18, %v40_v21 }
  0x33   :  { %v51_v25 = vmax.f32 %v49_v23, 0.0001  ;;  %v50_v26 = vsel %vm48_vm3, %v22_v1, %v46_v24 }
  0x34   :  { %v52_v27 = vmax.f32 %v50_v26, 0.0001 }
  0x35   :  { %v53_v28 = vmin.f32 %v51_v25, 1000.0 }
  0x36   :  { %v54_v29 = vmin.f32 %v52_v27, 1000.0 }
  0x37   :  { %55 = vst [vmem:[#allocation5] sm:$0xff] %v53_v28 }
  0x38   :  { %56 = vst [vmem:[#allocation5 + $0x8] sm:$0xff] %v54_v29 }
  0x39   :  { %115 = shalt.err (!%p112_p12)
}
  0x3a   :  { %s116_s22 = scalar_lea.hbm %s167_s1, 256 }
  0x3b   :  { %p117_p13 = scmp.ne.s32.totalorder %s167_s1, %s116_s22  ;;  %p120_p0 = scmp.lt.u32.totalorder %s116_s22, %s167_s1 }
  0x3d   :  { %p122_p1 = pnand %p120_p0, %p117_p13 }
  0x3f   :  { %125 = shalt.err (!%p122_p1)
}
  0x40   :  { %66 = dma.vmem_to_hbm [thread:$0]  %s64_s18, 256, %s167_s1, [#allocation4]  }
  0x41   :  { %128 = dma.done.wait [#allocation4], 256  }
  0x42   :  { %129 = vsyncadd [#allocation4], 4294967040 }
  0x43   :  { %70 = vsyncpa [#allocation3], 1 }
  0x44   :  { %71 = vsyncpa [#allocation4], 1 }

</bundles_post_ra>
